<compile_context>
chip_gen: v6e
topology: v6e:2x2x1
jax: 0.10.0
libtpu: 0.0.40
codegen_flags: <defaults>
</compile_context>

<pallas_src>
import jax
import jax.numpy as jnp
from jax.experimental import pallas as pl
from jax.experimental.pallas import tpu as pltpu


def _identity_copy_kernel(x_ref, o_ref):
    # Pure streaming copy of the current VMEM tile (1 vld + 1 vst per vreg).
    o_ref[...] = x_ref[...]


def _lane_dense_2d(total, fallback_rows, fallback_cols):
    """Pick a (rows, cols) factorization with cols a multiple of 128.

    Prefers wide lane dims while keeping rows >= 16 so the row grid can be
    split into >= 2 programs (v7x has 2 TensorCores).  Falls back to the
    natural (B*C, H*W) view if the element count is not 128-divisible.
    """
    if total % 128 == 0:
        for cols in (4096, 2048, 1024, 512, 256, 128):
            if total % cols == 0 and (total // cols) >= 16:
                return total // cols, cols
        for cols in (4096, 2048, 1024, 512, 256, 128):
            if total % cols == 0:
                return total // cols, cols
    return fallback_rows, fallback_cols


def _pick_tile_rows(rows, row_bytes):
    """Byte-budgeted row tile: multiple of 8, <= ~4 MiB, >= 2 grid steps if possible."""
    TILE_BYTE_BUDGET = 4 * 1024 * 1024  # 4 buffers resident -> <= 16 MiB scoped VMEM
    if rows < 8:
        # Too few rows to satisfy the (8, 128) rule with a sub-block;
        # a full-extent block is exempt (and tiny anyway).
        return rows
    cap = max(8, (TILE_BYTE_BUDGET // max(row_bytes, 1)) // 8 * 8)
    tile_r = min(cap, max(8, (rows // 8) * 8))
    # v7x: make sure both TensorCores get work when rows allow it.
    if pl.cdiv(rows, tile_r) < 2 and rows >= 16:
        tile_r = max(8, ((rows // 2) // 8) * 8)
    return tile_r


@jax.jit
def identity_touch(x):
    """Demo-only Pallas identity copy of an NCHW tensor (not used by QHead).

    x: [B, C, H, W]. Returns an array equal to x.
    """
    B, C, H, W = x.shape
    total = B * C * H * W
    rows, cols = _lane_dense_2d(total, B * C, H * W)
    x2d = x.reshape(rows, cols)

    dtype_bytes = jnp.dtype(x.dtype).itemsize
    tile_r = _pick_tile_rows(rows, cols * dtype_bytes)
    grid = (pl.cdiv(rows, tile_r),)

    out2d = pl.pallas_call(
        _identity_copy_kernel,
        out_shape=jax.ShapeDtypeStruct((rows, cols), x.dtype),
        grid=grid,
        in_specs=[pl.BlockSpec((tile_r, cols), lambda i: (i, 0))],
        out_specs=pl.BlockSpec((tile_r, cols), lambda i: (i, 0)),
        compiler_params=pltpu.CompilerParams(
            dimension_semantics=("parallel",),
            vmem_limit_bytes=32 * 1024 * 1024,  # safe on v5e/v6e/v7x
        ),
    )(x2d)
    return out2d.reshape(B, C, H, W)


def qhead_forward(x):
    """Exact semantics of QHead.forward: always returns (None, None, None).

    No Pallas kernel is launched here -- the module performs no computation,
    so the hot path performs none either (zero HBM traffic, zero launches).
    """
    disc_logits, mu, var = (None, None, None)
    return (disc_logits, mu, var)


if __name__ == "__main__":
    key = jax.random.PRNGKey(0)
    # Small NCHW input consistent with an MNIST-style feature map.
    x = jax.random.normal(key, (2, 4, 16, 16), dtype=jnp.float32)

    # Run the demo identity kernel once and block on it (smoke test only).
    touched = identity_touch(x)
    jax.block_until_ready(touched)
    assert touched.shape == x.shape
    assert jnp.allclose(touched, x)

    # Actual module semantics: no kernel, returns (None, None, None).
    disc_logits, mu, var = qhead_forward(x)
    assert disc_logits is None and mu is None and var is None

    print("KERNEL_OK")
</pallas_src>

<mosaic_0001>
module attributes {stable_mosaic.version = 11 : i64} {
  func.func @_identity_copy_kernel(%arg0: i32, %arg1: memref<8x128xf32, #tpu.memory_space<vmem>>, %arg2: memref<8x128xf32, #tpu.memory_space<vmem>>) attributes {dimension_semantics = [#tpu.dimension_semantics<parallel>], iteration_bounds = array<i64: 2>, scalar_prefetch = 0 : i64, scratch_operands = 0 : i64, tpu.core_type = #tpu.core_type<tc>, window_params = [{transform_indices = @transform_0, window_bounds = array<i64: 8, 128>}, {transform_indices = @transform_1, window_bounds = array<i64: 8, 128>}]} {
    %c0 = arith.constant 0 : index
    %c0_0 = arith.constant 0 : index
    %0 = vector.load %arg1[%c0, %c0_0] : memref<8x128xf32, #tpu.memory_space<vmem>>, vector<8x128xf32>
    %c0_1 = arith.constant 0 : index
    %c0_2 = arith.constant 0 : index
    %1 = vector.load %arg2[%c0_1, %c0_2] : memref<8x128xf32, #tpu.memory_space<vmem>>, vector<8x128xf32>
    tpu.vector_store %arg2[%c0_1, %c0_2], %0 {strides = array<i32>} : memref<8x128xf32, #tpu.memory_space<vmem>>, vector<8x128xf32>,
    return
  }
  func.func @transform_0(%arg0: i32) -> (i32, i32) {
    %c0_i32 = arith.constant 0 : i32
    %c0_i32_0 = arith.constant 0 : i32
    return %arg0, %c0_i32 : i32, i32
  }
  func.func @transform_1(%arg0: i32) -> (i32, i32) {
    %c0_i32 = arith.constant 0 : i32
    %c0_i32_0 = arith.constant 0 : i32
    return %arg0, %c0_i32 : i32, i32
  }
}

</mosaic_0001>

<bundles_post_ra>
// kernel: identity_touch.1
= control target key start
LH: loop header
LB: loop body
LE: loop exit
PB: predicated region body
PF: predicated region fallthrough
CT: control target
= control target key end

     0   :  { %s188_s6 = smov 0   ;;  %s208_s0 = inlined_call_operand.vmem [shape: f32[16,128], index: 0, kind: input, shape index: {}]   ;;  %s209_s1 = inlined_call_operand.vmem [shape: f32[16,128], index: 1, kind: output, shape index: {}]  }
   0x1 LB: > { %s167_s7 = sadd.s32 4294967295, %s190_s6   ;;  %p171_p0 = scmp.ge.s32.totalorder %s190_s6, 1  ;;  %s190_s6 = sphi %s188_s6, %s11_s6  }
   0x2   : > { %p86_p1 = scmp.lt.s32.totalorder %s190_s6, 3 }
   0x4   : > { %p87_p2 = pnand %p171_p0, %p86_p1 }
   0x5   : > { %p104_p3 = scmp.lt.s32.totalorder (!%p87_p2), %s167_s7, 1 }
   0x6   : > { %90 = sbr.rel (%p87_p2) target bundleno = 16 (0x10), region = 24 }
   0xb   : > { %s211_s7 = smov (!%p104_p3, %s167_s7), 1 }
   0xc   : > { %s172_s8 = sshll.u32 %s211_s7, 3 }
   0xd   : > { %s107_s11 = scalar_lea.vmem %s208_s0, %s172_s8  ;;  %s111_s14 = scalar_lea.vmem %s209_s1, %s172_s8 }
   0xe   : > { %v112_v0 = vld [vmem:[%s107_s11] sm:$0xff] }
   0xf   : > { %113 = vst [vmem:[%s111_s14] sm:$0xff] %v112_v0 }
  0x10 PF: > { %s11_s6 = sadd.s32 1, %s190_s6  }
  0x11   : > { %p8_p4 = scmp.ge.s32.totalorder %s11_s6, 4  }
  0x13   :  { %10 = sbr.rel (!%p8_p4) target bundleno = 1 (0x1), region = 54 }

</bundles_post_ra>
